<compile_context>
chip_gen: v6e
topology: v6e:2x2x1
jax: 0.10.0
libtpu: 0.0.40
codegen_flags: <defaults>
</compile_context>

<pallas_src>
import functools

import jax
import jax.numpy as jnp
from jax import lax
from jax.experimental import pallas as pl
from jax.experimental.pallas import tpu as pltpu

_CP = 16  # channel pad unit (bf16 sublane packing: 16 rows / vreg)


def _padc(c):
    return ((c + _CP - 1) // _CP) * _CP


# ----------------------------------------------------------------------------
# Fused kernel
# ----------------------------------------------------------------------------
def _rfb_kernel(x_ref, wh_ref, ws2_ref, wb12_ref, wb22_ref, wb23_ref, wt_ref,
                bias_ref, o_ref, patch_ref, *, H, W, roll_sign, meta):
    x = x_ref[0]                                   # (cin_pad, L) bf16
    L = x.shape[-1]
    HW = H * W

    # Per-image row/col: the batch is folded into the lane axis, each image
    # occupying a contiguous HW chunk, so these masks also kill cross-image
    # bleed caused by the full-lane pltpu.roll.
    pos = lax.broadcasted_iota(jnp.int32, (1, L), 1)
    img = pos // HW
    q = pos - img * HW
    row = q // W
    col = q - row * W

    mask_cache = {}

    def border_mask(oh, ow):
        key = (oh, ow)
        if key not in mask_cache:
            parts = []
            if oh > 0:
                parts.append(row < H - oh)
            if oh < 0:
                parts.append(row >= -oh)
            if ow > 0:
                parts.append(col < W - ow)
            if ow < 0:
                parts.append(col >= -ow)
            mask_cache[key] = (functools.reduce(jnp.logical_and, parts)
                               if parts else None)
        return mask_cache[key]

    def shifted(a, oh, ow):
        """a[c, p] -> a[c, pixel shifted by (oh, ow)] with zero border."""
        sh = oh * W + ow
        if sh == 0:
            return a
        y = pltpu.roll(a, shift=(-roll_sign * sh) % L, axis=1)
        m = border_mask(oh, ow)
        return jnp.where(m, y, 0.0) if m is not None else y

    def to_patch(a, offsets):
        """Write the im2col patch of `a` into the shared VMEM scratch (bf16)."""
        c = a.shape[0]
        for t, (oh, ow) in enumerate(offsets):
            patch_ref[t * c:(t + 1) * c, :] = shifted(a, oh, ow).astype(
                jnp.bfloat16)
        return len(offsets) * c

    def matmul(w_ref, rhs, bias_name):
        m = w_ref.shape[0]
        off = meta["bias_offs"][bias_name]
        y = jnp.dot(w_ref[...], rhs, preferred_element_type=jnp.float32)
        return y + bias_ref[off:off + m, :]

    # Stage 1: fused 1x1 heads of all three branches (all ReLU).
    mid1 = jnp.maximum(matmul(wh_ref, x, "head"), 0.0)            # (M1, L)

    # Stage 2: fused (3,1) convs b0_1 / b1_1 / b2_1 (identical tap offsets at
    # visual==1).  ReLU only on the b1/b2 segments (branch0's conv has no act).
    k = to_patch(mid1, meta["off_s2"])
    y2 = matmul(ws2_ref, patch_ref[0:k, :], "s2")                 # (M2, L)
    o0, o1 = meta["mid2_off"][1], meta["mid2_off"][2]
    b0_fin = y2[0:o0]
    b1_mid = jnp.maximum(y2[o0:o1], 0.0)
    b2_mid = jnp.maximum(y2[o1:meta["m2"]], 0.0)

    # Branch1 tail: 3x3, pad/dil (v+1, 1), no activation.
    k = to_patch(b1_mid, meta["off_b12"])
    b1_fin = matmul(wb12_ref, patch_ref[0:k, :], "b12")

    # Branch2 tail: 3x3 (ReLU), then 3x3 pad/dil (2v+1, 1), no activation.
    k = to_patch(b2_mid, meta["off_b22"])
    b2_m2 = jnp.maximum(matmul(wb22_ref, patch_ref[0:k, :], "b22"), 0.0)
    k = to_patch(b2_m2, meta["off_b23"])
    b2_fin = matmul(wb23_ref, patch_ref[0:k, :], "b23")

    # Tail: ONE matmul for [res_scale*ConvLinear | shortcut] over [cat | x];
    # res_scale already folded into the packed weight/bias.
    t0, t1, t2, tx = meta["tail_offs"]
    patch_ref[t0:t0 + b0_fin.shape[0], :] = b0_fin.astype(jnp.bfloat16)
    patch_ref[t1:t1 + b1_fin.shape[0], :] = b1_fin.astype(jnp.bfloat16)
    patch_ref[t2:t2 + b2_fin.shape[0], :] = b2_fin.astype(jnp.bfloat16)
    patch_ref[tx:tx + x.shape[0], :] = x
    y = matmul(wt_ref, patch_ref[0:meta["k_tail"], :], "tail")
    o_ref[0] = jnp.maximum(y, 0.0)


# ----------------------------------------------------------------------------
# pltpu.roll convention probe (resolves rotation direction at runtime)
# ----------------------------------------------------------------------------
def _probe_roll_direction():
    """+1 if pltpu.roll follows the np.roll convention
    (out[i] == x[(i - shift) % n]), -1 if it rotates the other way."""
    def k(x_ref, o_ref):
        o_ref[...] = pltpu.roll(x_ref[...], shift=1, axis=1)

    x = jnp.tile(jnp.arange(128, dtype=jnp.float32)[None, :], (8, 1))
    y = pl.pallas_call(
        k, out_shape=jax.ShapeDtypeStruct((8, 128), jnp.float32))(x)
    first = float(y[0, 0])
    if first == 127.0:
        return 1
    if first == 1.0:
        return -1
    raise RuntimeError(f"unexpected pltpu.roll semantics (probe value {first})")


# ----------------------------------------------------------------------------
# Parameter construction (ConvModule = Conv(no bias) + BN, inference form)
# ----------------------------------------------------------------------------
def make_conv_params(key, cin, cout, kh, kw):
    ks = jax.random.split(key, 5)
    fan_in = cin * kh * kw
    w = jax.random.normal(ks[0], (kh, kw, cin, cout), jnp.float32) / jnp.sqrt(
        jnp.float32(fan_in))
    gamma = 1.0 + 0.1 * jax.random.normal(ks[1], (cout,), jnp.float32)
    beta = 0.1 * jax.random.normal(ks[2], (cout,), jnp.float32)
    mean = 0.1 * jax.random.normal(ks[3], (cout,), jnp.float32)
    var = 1.0 + 0.5 * jnp.abs(jax.random.normal(ks[4], (cout,), jnp.float32))
    bn_scale = gamma / jnp.sqrt(var + 1e-5)
    bn_bias = beta - mean * bn_scale
    return {"w": w, "scale": bn_scale, "bias": bn_bias}


def make_basic_rfb_params(key, in_planes, out_planes):
    inter = in_planes // 8
    ks = jax.random.split(key, 11)
    return {
        "b0_0": make_conv_params(ks[0], in_planes, 2 * inter, 1, 1),
        "b0_1": make_conv_params(ks[1], 2 * inter, 2 * inter, 3, 1),
        "b1_0": make_conv_params(ks[2], in_planes, inter, 1, 1),
        "b1_1": make_conv_params(ks[3], inter, 2 * inter, 3, 1),
        "b1_2": make_conv_params(ks[4], 2 * inter, 2 * inter, 3, 3),
        "b2_0": make_conv_params(ks[5], in_planes, inter, 1, 1),
        "b2_1": make_conv_params(ks[6], inter, (inter // 2) * 3, 3, 1),
        "b2_2": make_conv_params(ks[7], (inter // 2) * 3, 2 * inter, 3, 3),
        "b2_3": make_conv_params(ks[8], 2 * inter, 2 * inter, 3, 3),
        "linear": make_conv_params(ks[9], 6 * inter, out_planes, 1, 1),
        "short": make_conv_params(ks[10], in_planes, out_planes, 1, 1),
    }


# ----------------------------------------------------------------------------
# BN folding + fused-matmul weight packing
# ----------------------------------------------------------------------------
def pack_rfb_params(params, in_planes, out_planes, *, scale, visual):
    """Fold BN (and res_scale) into conv weights and pack them for the fused
    kernel layout.  Returns (weights_dict (bf16), bias_slab (f32), meta)."""
    if visual != 1:
        raise NotImplementedError("fused BasicRFB packing: visual=1 only")
    inter = in_planes // 8
    v = visual
    f32 = jnp.float32

    def folded(p):
        return p["w"] * p["scale"], p["bias"]      # BN folded into weight

    cin_p = _padc(in_planes)
    out_p = _padc(out_planes)

    # mid1 layout: [b0_head | b1_head | b2_head], each padded to 16 channels.
    ph = (_padc(2 * inter), _padc(inter), _padc(inter))
    mid1_off = (0, ph[0], ph[0] + ph[1])
    M1 = sum(ph)

    # --- stage 1: fused 1x1 heads ------------------------------------------
    w_head = jnp.zeros((M1, cin_p), f32)
    b_head = jnp.zeros((M1,), f32)
    for s, name in enumerate(("b0_0", "b1_0", "b2_0")):
        w, b = folded(params[name])                # (1,1,in_planes,cout)
        co = w.shape[-1]
        w_head = w_head.at[mid1_off[s]:mid1_off[s] + co,
                           :in_planes].set(w[0, 0].T)
        b_head = b_head.at[mid1_off[s]:mid1_off[s] + co].set(b)

    # mid2 layout: [b0_final | b1_mid | b2_mid]
    qseg = (_padc(2 * inter), _padc(2 * inter), _padc((inter // 2) * 3))
    mid2_off = (0, qseg[0], qseg[0] + qseg[1])
    M2 = sum(qseg)

    # --- stage 2: fused (3,1) convs b0_1 / b1_1 / b2_1 -----------------------
    off_s2 = [(-1, 0), (0, 0), (1, 0)]             # shared taps at visual==1
    K2 = 3 * M1
    w_s2 = jnp.zeros((M2, K2), f32)
    b_s2 = jnp.zeros((M2,), f32)
    for s, name in enumerate(("b0_1", "b1_1", "b2_1")):
        w, b = folded(params[name])                # (3,1,cin_s,cout_s)
        ci, co = w.shape[2], w.shape[3]
        for t in range(3):                         # block-diagonal per tap
            col0 = t * M1 + mid1_off[s]
            w_s2 = w_s2.at[mid2_off[s]:mid2_off[s] + co,
                           col0:col0 + ci].set(w[t, 0].T)
        b_s2 = b_s2.at[mid2_off[s]:mid2_off[s] + co].set(b)

    # --- single-input 3x3 convs ----------------------------------------------
    def pack_single(name, cp_in, ph_, pw_, dh_, dw_):
        w, b = folded(params[name])                # (kh,kw,cin,cout)
        kh, kw, ci, co = w.shape
        cout_p = _padc(co)
        wm = jnp.zeros((cout_p, kh * kw * cp_in), f32)
        offs = []
        for i in range(kh):
            for j in range(kw):
                t = i * kw + j
                offs.append((i * dh_ - ph_, j * dw_ - pw_))
                wm = wm.at[:co, t * cp_in:t * cp_in + ci].set(w[i, j].T)
        bm = jnp.zeros((cout_p,), f32).at[:co].set(b)
        return wm, bm, offs, cout_p

    w_b12, b_b12, off_b12, cb1f = pack_single("b1_2", qseg[1], v + 1, 1, v + 1, 1)
    w_b22, b_b22, off_b22, cb2m = pack_single("b2_2", qseg[2], 1, 1, 1, 1)
    w_b23, b_b23, off_b23, cb2f = pack_single("b2_3", cb2m, 2 * v + 1, 1,
                                              2 * v + 1, 1)

    # --- tail: [res_scale*ConvLinear | shortcut] fused along K ----------------
    wl, bl = folded(params["linear"])              # (1,1,6*inter,out_planes)
    ws, bs = folded(params["short"])               # (1,1,in_planes,out_planes)
    two_i = 2 * inter
    t_off0 = 0
    t_off1 = qseg[0]
    t_off2 = qseg[0] + cb1f
    t_offx = qseg[0] + cb1f + cb2f
    Kt = t_offx + cin_p
    w_tail = jnp.zeros((out_p, Kt), f32)
    w_tail = w_tail.at[:out_planes, t_off0:t_off0 + two_i].set(
        scale * wl[0, 0, 0:two_i].T)
    w_tail = w_tail.at[:out_planes, t_off1:t_off1 + two_i].set(
        scale * wl[0, 0, two_i:2 * two_i].T)
    w_tail = w_tail.at[:out_planes, t_off2:t_off2 + two_i].set(
        scale * wl[0, 0, 2 * two_i:3 * two_i].T)
    w_tail = w_tail.at[:out_planes, t_offx:t_offx + in_planes].set(ws[0, 0].T)
    b_tail = jnp.zeros((out_p,), f32).at[:out_planes].set(scale * bl + bs)

    # --- bias slab (one operand) ---------------------------------------------
    bias_list = [("head", b_head), ("s2", b_s2), ("b12", b_b12),
                 ("b22", b_b22), ("b23", b_b23), ("tail", b_tail)]
    bias_offs, acc = {}, 0
    for name, b in bias_list:
        bias_offs[name] = acc
        acc += b.shape[0]
    bias_slab = jnp.concatenate([b for _, b in bias_list]).reshape(-1, 1)

    weights = {
        "head": w_head.astype(jnp.bfloat16),
        "s2": w_s2.astype(jnp.bfloat16),
        "b12": w_b12.astype(jnp.bfloat16),
        "b22": w_b22.astype(jnp.bfloat16),
        "b23": w_b23.astype(jnp.bfloat16),
        "tail": w_tail.astype(jnp.bfloat16),
    }
    meta = dict(
        cin_pad=cin_p, out_pad=out_p, out_planes=out_planes,
        m1=M1, m2=M2, mid2_off=mid2_off,
        off_s2=off_s2, off_b12=off_b12, off_b22=off_b22, off_b23=off_b23,
        tail_offs=(t_off0, t_off1, t_off2, t_offx), k_tail=Kt,
        bias_offs=bias_offs,
        maxk=max(K2, 9 * qseg[1], 9 * qseg[2], 9 * cb2m, Kt),
    )
    return weights, bias_slab, meta


# ----------------------------------------------------------------------------
# Fused forward wrapper
# ----------------------------------------------------------------------------
def _default_num_groups(n):
    """One grid step per TensorCore when detectable (v7x: 2 TCs/chip);
    otherwise a single step with the whole batch folded into the lane axis."""
    try:
        cores = int(getattr(jax.devices()[0], "num_cores", 1) or 1)
    except Exception:
        cores = 1
    g = max(1, min(cores, n))
    while n % g:
        g -= 1
    return g


def basic_rfb_forward(x_nchw, weights, bias_slab, *, meta, visual=1, stride=1,
                      roll_sign=1, num_groups=None):
    """Fused BasicRFB forward.  (N, Cin, H, W) f32 -> (N, Cout, H, W) f32."""
    if stride != 1 or visual != 1:
        # TODO(synk): stride>1 / visual>1 change the spatial size of the inner
        # (3,1) convs; the fused same-spatial kernel covers the default
        # (stride=1, visual=1) configuration only.
        raise NotImplementedError("fused BasicRFB kernel: stride=1, visual=1 only")

    N, Cin, H, W = x_nchw.shape
    HW = H * W
    cin_p = meta["cin_pad"]
    out_p = meta["out_pad"]
    out_planes = meta["out_planes"]

    G = _default_num_groups(N) if num_groups is None else num_groups
    assert N % G == 0, (N, G)
    per = N // G
    L = per * HW

    # Lane-dense (C, per*HW) layout with the batch folded into lanes.
    xf = x_nchw.reshape(N, Cin, HW)
    if cin_p != Cin:
        xf = jnp.pad(xf, ((0, 0), (0, cin_p - Cin), (0, 0)))
    xf = xf.astype(jnp.bfloat16)
    xf = xf.reshape(G, per, cin_p, HW).transpose(0, 2, 1, 3).reshape(G, cin_p, L)

    w_order = ("head", "s2", "b12", "b22", "b23", "tail")
    w_args = [weights[k] for k in w_order]

    in_specs = [pl.BlockSpec((1, cin_p, L), lambda g: (g, 0, 0))]
    in_specs += [pl.BlockSpec(w.shape, lambda g: (0, 0)) for w in w_args]
    in_specs += [pl.BlockSpec(bias_slab.shape, lambda g: (0, 0))]

    kernel = functools.partial(_rfb_kernel, H=H, W=W, roll_sign=roll_sign,
                               meta=meta)

    # TODO(synk): production-sized RFB inputs (in_planes>=256, large H*W) need
    # a spatial (lane) tiling path with a dilation halo and an explicit
    # vmem_limit_bytes (v7x has only 64 MiB VMEM); at these shapes the whole
    # working set fits comfortably in one lane-dense block.
    out = pl.pallas_call(
        kernel,
        out_shape=jax.ShapeDtypeStruct((G, out_p, L), jnp.float32),
        grid=(G,),
        in_specs=in_specs,
        out_specs=pl.BlockSpec((1, out_p, L), lambda g: (g, 0, 0)),
        scratch_shapes=[pltpu.VMEM((meta["maxk"], L), jnp.bfloat16)],
        compiler_params=pltpu.CompilerParams(
            dimension_semantics=("parallel",)),
    )(xf, *w_args, bias_slab)

    out = out.reshape(G, out_p, per, HW).transpose(0, 2, 1, 3)
    out = out.reshape(N, out_p, HW)[:, :out_planes, :]
    return out.reshape(N, out_planes, H, W)


# ----------------------------------------------------------------------------
# Pure-JAX references (correctness checking only; not Pallas)
# ----------------------------------------------------------------------------
def _ref_conv_bn(x, p, *, ph, pw, dh, dw, relu, quant=False,
                 w_pre_scale=1.0, b_pre_scale=1.0):
    w_eff = p["w"] * p["scale"] * w_pre_scale      # fold BN (+ optional scale)
    b_eff = p["bias"] * b_pre_scale
    if quant:                                      # mirror kernel bf16 operands
        w_eff = w_eff.astype(jnp.bfloat16).astype(jnp.float32)
        x = x.astype(jnp.bfloat16).astype(jnp.float32)
    y = lax.conv_general_dilated(
        x, w_eff, window_strides=(1, 1), padding=((ph, ph), (pw, pw)),
        rhs_dilation=(dh, dw), dimension_numbers=("NCHW", "HWIO", "NCHW"),
        precision=lax.Precision.HIGHEST)
    y = y + b_eff[None, :, None, None]
    return jnp.maximum(y, 0.0) if relu else y


def basic_rfb_reference(x, params, *, scale=0.1, visual=1, quant=False):
    v = visual
    cb = functools.partial(_ref_conv_bn, quant=quant)
    b0 = cb(x, params["b0_0"], ph=0, pw=0, dh=1, dw=1, relu=True)
    b0 = cb(b0, params["b0_1"], ph=v, pw=0, dh=v, dw=v, relu=False)
    b1 = cb(x, params["b1_0"], ph=0, pw=0, dh=1, dw=1, relu=True)
    b1 = cb(b1, params["b1_1"], ph=v, pw=0, dh=1, dw=1, relu=True)
    b1 = cb(b1, params["b1_2"], ph=v + 1, pw=1, dh=v + 1, dw=1, relu=False)
    b2 = cb(x, params["b2_0"], ph=0, pw=0, dh=1, dw=1, relu=True)
    b2 = cb(b2, params["b2_1"], ph=v, pw=0, dh=1, dw=1, relu=True)
    b2 = cb(b2, params["b2_2"], ph=1, pw=1, dh=1, dw=1, relu=True)
    b2 = cb(b2, params["b2_3"], ph=2 * v + 1, pw=1, dh=2 * v + 1, dw=1,
            relu=False)
    cat = jnp.concatenate([b0, b1, b2], axis=1)
    short = cb(x, params["short"], ph=0, pw=0, dh=1, dw=1, relu=False)
    if quant:
        # Mirror the kernel numerics: res_scale folded into ConvLinear before
        # bf16 quantization, then a plain add.
        out = cb(cat, params["linear"], ph=0, pw=0, dh=1, dw=1, relu=False,
                 w_pre_scale=scale, b_pre_scale=scale)
        return jnp.maximum(out + short, 0.0)
    out = cb(cat, params["linear"], ph=0, pw=0, dh=1, dw=1, relu=False)
    return jnp.maximum(out * scale + short, 0.0)


# ----------------------------------------------------------------------------
if __name__ == "__main__":
    IN_PLANES = 32          # inter_planes = in_planes // 8 = 4
    OUT_PLANES = 32
    N, H, W = 2, 16, 16
    SCALE, VISUAL, STRIDE = 0.1, 1, 1

    root = jax.random.PRNGKey(0)
    kx, kp = jax.random.split(root)
    x = jax.random.normal(kx, (N, IN_PLANES, H, W), jnp.float32)   # NCHW
    params = make_basic_rfb_params(kp, IN_PLANES, OUT_PLANES)
    weights, bias_slab, meta = pack_rfb_params(
        params, IN_PLANES, OUT_PLANES, scale=SCALE, visual=VISUAL)

    roll_sign = _probe_roll_direction()

    fwd = jax.jit(functools.partial(
        basic_rfb_forward, meta=meta, visual=VISUAL, stride=STRIDE,
        roll_sign=roll_sign))
    y = fwd(x, weights, bias_slab)
    jax.block_until_ready(y)

    assert y.shape == (N, OUT_PLANES, H, W), y.shape
    assert bool(jnp.all(jnp.isfinite(y)))
    assert bool(jnp.all(y >= 0.0)), "ReLU output must be non-negative"

    # Tight check vs a reference that mirrors the kernel's bf16-operand /
    # f32-accumulate numerics exactly.
    y_q = basic_rfb_reference(x, params, scale=SCALE, visual=VISUAL, quant=True)
    mag_q = float(jnp.max(jnp.abs(y_q)))
    err_q = float(jnp.max(jnp.abs(y - y_q)))
    assert err_q <= 2e-3 * max(1.0, mag_q), (
        f"kernel mismatch vs bf16-operand reference: max abs err {err_q:.3e}")

    # Loose sanity check vs the pure-f32 reference of the original module.
    y_f = basic_rfb_reference(x, params, scale=SCALE, visual=VISUAL, quant=False)
    mag_f = float(jnp.max(jnp.abs(y_f)))
    err_f = float(jnp.max(jnp.abs(y - y_f)))
    assert err_f <= 5e-2 * max(1.0, mag_f), (
        f"kernel mismatch vs f32 reference: max abs err {err_f:.3e}")

    print("KERNEL_OK")
</pallas_src>

<mosaic_0001>
module attributes {stable_mosaic.version = 11 : i64} {
  func.func @k(%arg0: memref<8x128xf32, #tpu.memory_space<vmem>>, %arg1: memref<8x128xf32, #tpu.memory_space<vmem>>) attributes {dimension_semantics = [], scalar_prefetch = 0 : i64, scratch_operands = 0 : i64, tpu.core_type = #tpu.core_type<tc>} {
    %c0 = arith.constant 0 : index
    %c0_0 = arith.constant 0 : index
    %0 = vector.load %arg0[%c0, %c0_0] : memref<8x128xf32, #tpu.memory_space<vmem>>, vector<8x128xf32>
    %c1_i32 = arith.constant 1 : i32
    %1 = tpu.dynamic_rotate %0 by %c1_i32 dim 1 : vector<8x128xf32>, i32 -> vector<8x128xf32>
    %c0_1 = arith.constant 0 : index
    %c0_2 = arith.constant 0 : index
    %2 = vector.load %arg1[%c0_1, %c0_2] : memref<8x128xf32, #tpu.memory_space<vmem>>, vector<8x128xf32>
    tpu.vector_store %arg1[%c0_1, %c0_2], %1 {strides = array<i32>} : memref<8x128xf32, #tpu.memory_space<vmem>>, vector<8x128xf32>,
    return
  }
}

</mosaic_0001>

<bundles_post_ra>
// kernel: tpu_custom_call.1
= control target key start
LH: loop header
LB: loop body
LE: loop exit
PB: predicated region body
PF: predicated region fallthrough
CT: control target
= control target key end

     0   :  { %6 = vsyncpa [#allocation3], 0  ;;  %s106_s0 = inlined_call_operand.hbm [shape: f32[8,128], index: 0, kind: input, shape index: {}]   ;;  %s107_s1 = inlined_call_operand.hbm [shape: f32[8,128], index: 1, kind: output, shape index: {}]  }
   0x1   :  { %7 = vsyncpa [#allocation4], 0  ;;  %s87_s6 = smov [#allocation2]  }
   0x2   :  { %s14_s7 = sshll.u32 %s87_s6, 4  ;;  %s15_s7 = int_to_ptr.vmem [resolvable:$true] %s14_s7 }
   0x3   :  { %s51_s8 = scalar_lea.vmem %s15_s7, 128  ;;  %p56_p1 = scmp.lt.s32.totalorder %s15_s7, %s15_s7 }
   0x4   :  { %p52_p0 = scmp.ne.s32.totalorder %s15_s7, %s51_s8  ;;  %p57_p2 = scmp.lt.s32.totalorder %s51_s8, %s51_s8 }
   0x6   :  { %p58_p3 = por %p57_p2, %p56_p1 }
   0x8   :  { %p59_p4 = pnand %p58_p3, %p52_p0 }
   0xa   :  { %62 = shalt.err (!%p59_p4)
}
   0xb   :  { %17 = dma.hbm_to_vmem [thread:$0]  %s106_s0, 128, %s15_s7, [#allocation3]  }
   0xc   :  { %83 = dma.done.wait [#allocation3], 128  }
   0xd   :  { %84 = vsyncadd [#allocation3], 4294967168  ;;  %v21_v0 = vld [vmem:[#allocation2] sm:$0xff]  ;;  %s88_s11 = smov 1   ;;  %s89_s12 = smov [#allocation5]  }
   0xe   :  { %22 = vrot.lane.b32.xlu0 %v21_v0, %s88_s11  ;;  %s31_s13 = sshll.u32 %s89_s12, 4  ;;  %s32_s13 = int_to_ptr.vmem [resolvable:$true] %s31_s13 }
   0xf   :  { %s63_s14 = scalar_lea.vmem %s32_s13, 128  ;;  %p68_p6 = scmp.lt.s32.totalorder %s32_s13, %s32_s13 }
  0x10   :  { %p64_p5 = scmp.ne.s32.totalorder %s32_s13, %s63_s14  ;;  %p69_p7 = scmp.lt.s32.totalorder %s63_s14, %s63_s14 }
  0x12   :  { %p70_p8 = por %p69_p7, %p68_p6 }
  0x14   :  { %p71_p9 = pnand %p70_p8, %p64_p5 }
  0x80   :  { %v23_v1 = vpop.permute.xlu0 %22 }
  0x81   :  { %24 = vst [vmem:[#allocation5] sm:$0xff] %v23_v1 }
  0x82   :  { %74 = shalt.err (!%p71_p9)
}
  0x83   :  { %34 = dma.vmem_to_hbm [thread:$0]  %s32_s13, 128, %s107_s1, [#allocation4]  }
  0x84   :  { %85 = dma.done.wait [#allocation4], 128  }
  0x85   :  { %86 = vsyncadd [#allocation4], 4294967168 }
  0x86   :  { %38 = vsyncpa [#allocation3], 1 }
  0x87   :  { %39 = vsyncpa [#allocation4], 1 }

</bundles_post_ra>
